<compile_context>
chip_gen: v6e
topology: v6e:2x2x1
jax: 0.10.0
libtpu: 0.0.40
codegen_flags: <defaults>
</compile_context>

<pallas_src>
import jax
import jax.numpy as jnp
from jax.experimental import pallas as pl
from jax.experimental.pallas import tpu as pltpu

_LANE = 128


def _stable_sigmoid(z):
    # sigmoid(z) = exp(min(z,0)) / (1 + exp(-|z|))  -- never overflows.
    e = jnp.exp(-jnp.abs(z))                              # EUP
    num = jnp.where(z >= 0, 1.0, e)                       # VPU select
    return num * pl.reciprocal(1.0 + e, approx=False)     # EUP reciprocal


def ctr_mlp_kernel(x_ref, w1_ref, b1_ref, w2_ref, b2_ref, w3_ref, b3_ref, o_ref):
    # x_ref: (tb, D) compute dtype; weights compute dtype; biases f32;
    # o_ref: (tb//128, 128) f32 -- lane-dense, (8,128)-aligned output tile.
    wdt = w1_ref.dtype

    h1 = jnp.dot(x_ref[...], w1_ref[...],
                 preferred_element_type=jnp.float32) + b1_ref[...]
    h1 = jnp.maximum(h1, 0.0)                              # (tb, 128) f32

    h2 = jnp.dot(h1.astype(wdt), w2_ref[...],
                 preferred_element_type=jnp.float32) + b2_ref[...]
    h2 = jnp.maximum(h2, 0.0)                              # (tb, 64) f32

    # Final 64->1 layer, contracted over features so the result is already a
    # lane-dense (1, tb) row (no (tb,1) column / masked single-lane stores).
    logits = jnp.einsum("ok,bk->ob", w3_ref[...], h2.astype(wdt),
                        preferred_element_type=jnp.float32) + b3_ref[...]
    probs = _stable_sigmoid(logits).astype(o_ref.dtype)    # (1, tb)

    # Scatter the (1, tb) row into the (tb//128, 128) output tile: row j holds
    # batch elements [j*128, (j+1)*128).  Static unroll, 128-lane stores.
    rows = o_ref.shape[0]
    for j in range(rows):
        o_ref[pl.ds(j, 1), :] = probs[:, j * _LANE:(j + 1) * _LANE]


def ctr_mlp(x, params, *, tb=1024, compute_dtype=jnp.bfloat16):
    """x: (B, input_dim) float32.
    params: w1 (D,128), b1 (1,128), w2 (128,64), b2 (1,64), w3 (64,1), b3 (1,1).
    Returns (B, 1) float32 probabilities."""
    B, input_dim = x.shape

    # Batch tile selection.
    tb = max(_LANE, (int(tb) + _LANE - 1) // _LANE * _LANE)
    if B <= tb:
        # Single tile: clamp to the padded batch; output block == full array.
        tb = (B + _LANE - 1) // _LANE * _LANE
        n_tiles = 1
    else:
        # Multi-tile: tb must be a multiple of 1024 so the (tb//128, 128)
        # output block is divisible by (8, 128).
        tb = (tb + 1023) // 1024 * 1024
        n_tiles = pl.cdiv(B, tb)
    b_pad = n_tiles * tb
    if b_pad != B:
        x = jnp.pad(x, ((0, b_pad - B), (0, 0)))

    x = x.astype(compute_dtype)
    w1 = params["w1"].astype(compute_dtype)
    w2 = params["w2"].astype(compute_dtype)
    w3 = params["w3"].reshape(1, -1).astype(compute_dtype)   # (1, 64) row
    b1 = params["b1"].astype(jnp.float32)
    b2 = params["b2"].astype(jnp.float32)
    b3 = params["b3"].astype(jnp.float32)

    # Weights/biases are tiny: full-array blocks with constant block index keep
    # them VMEM-resident across all grid steps.
    const = lambda shape: pl.BlockSpec(shape, lambda i: (0, 0))

    out2d = pl.pallas_call(
        ctr_mlp_kernel,
        out_shape=jax.ShapeDtypeStruct((b_pad // _LANE, _LANE), jnp.float32),
        grid=(n_tiles,),
        in_specs=[
            pl.BlockSpec((tb, input_dim), lambda i: (i, 0)),   # x: tiled on batch
            const(w1.shape), const(b1.shape),
            const(w2.shape), const(b2.shape),
            const(w3.shape), const(b3.shape),
        ],
        out_specs=pl.BlockSpec((tb // _LANE, _LANE), lambda i: (i, 0)),
        compiler_params=pltpu.CompilerParams(
            dimension_semantics=("parallel",)),                # megacore on v7x
    )(x, w1, b1, w2, b2, w3, b3)

    return out2d.reshape(b_pad, 1)[:B]


def init_params(key, input_dim):
    """Deterministic init mimicking PyTorch Linear default U(-1/sqrt(fan_in), ..)."""
    ks = jax.random.split(key, 6)

    def linear(kw, kb, fan_in, fan_out):
        bound = 1.0 / jnp.sqrt(fan_in)
        w = jax.random.uniform(kw, (fan_in, fan_out), jnp.float32, -bound, bound)
        b = jax.random.uniform(kb, (1, fan_out), jnp.float32, -bound, bound)
        return w, b

    w1, b1 = linear(ks[0], ks[1], input_dim, 128)
    w2, b2 = linear(ks[2], ks[3], 128, 64)
    w3, b3 = linear(ks[4], ks[5], 64, 1)
    return {"w1": w1, "b1": b1, "w2": w2, "b2": b2, "w3": w3, "b3": b3}


if __name__ == "__main__":
    # Synthetic stand-in for len(all_tags) * 2 from the CSV (no file I/O here):
    # pretend len(all_tags) == 16  ->  input_dim = 32.
    # TODO(synk): input_dim derivation from mini_youtube8m.csv tags is replaced
    # by a fixed synthetic value; no clean in-kernel equivalent of the pandas step.
    input_dim = 32
    batch = 8

    key = jax.random.PRNGKey(0)
    kx, kp, kx2 = jax.random.split(key, 3)
    x = jax.random.normal(kx, (batch, input_dim), jnp.float32)
    params = init_params(kp, input_dim)

    # Pure-JAX reference of the original module's forward pass.
    def ref(x, p):
        h1 = jnp.maximum(x @ p["w1"] + p["b1"], 0.0)
        h2 = jnp.maximum(h1 @ p["w2"] + p["b2"], 0.0)
        return jax.nn.sigmoid(h2 @ p["w3"] + p["b3"])

    expected = ref(x, params)

    # f32 compute path -- tight check against the f32 reference.
    out_f32 = ctr_mlp(x, params, compute_dtype=jnp.float32)
    jax.block_until_ready(out_f32)
    assert out_f32.shape == (batch, 1)
    assert jnp.allclose(out_f32, expected, atol=1e-4, rtol=1e-4)

    # bf16 inputs/weights (HBM-bound streaming path), f32 accumulation -- loose check.
    out_bf16 = ctr_mlp(x, params)   # default compute_dtype=bfloat16
    jax.block_until_ready(out_bf16)
    assert out_bf16.shape == (batch, 1)
    assert jnp.allclose(out_bf16, expected, atol=2e-2)

    # Multi-tile path (n_tiles > 1, (8,128)-aligned lane-dense output blocks).
    big_batch = 2500
    x_big = jax.random.normal(kx2, (big_batch, input_dim), jnp.float32)
    out_big = ctr_mlp(x_big, params, tb=1024, compute_dtype=jnp.float32)
    jax.block_until_ready(out_big)
    assert out_big.shape == (big_batch, 1)
    assert jnp.allclose(out_big, ref(x_big, params), atol=1e-4, rtol=1e-4)

    print("KERNEL_OK")
</pallas_src>

<mosaic_0001>
module attributes {stable_mosaic.version = 11 : i64} {
  func.func @ctr_mlp_kernel(%arg0: i32, %arg1: memref<128x32xf32, #tpu.memory_space<vmem>>, %arg2: memref<32x128xf32, #tpu.memory_space<vmem>>, %arg3: memref<1x128xf32, #tpu.memory_space<vmem>>, %arg4: memref<128x64xf32, #tpu.memory_space<vmem>>, %arg5: memref<1x64xf32, #tpu.memory_space<vmem>>, %arg6: memref<1x64xf32, #tpu.memory_space<vmem>>, %arg7: memref<1x1xf32, #tpu.memory_space<vmem>>, %arg8: memref<1x128xf32, #tpu.memory_space<vmem>>) attributes {dimension_semantics = [#tpu.dimension_semantics<parallel>], iteration_bounds = array<i64: 1>, scalar_prefetch = 0 : i64, scratch_operands = 0 : i64, tpu.core_type = #tpu.core_type<tc>, window_params = [{transform_indices = @transform_0, window_bounds = array<i64: 128, 32>}, {pipeline_mode = #tpu.pipeline_mode<synchronous>, transform_indices = @transform_1, window_bounds = array<i64: 32, 128>}, {pipeline_mode = #tpu.pipeline_mode<synchronous>, transform_indices = @transform_2, window_bounds = array<i64: 1, 128>}, {pipeline_mode = #tpu.pipeline_mode<synchronous>, transform_indices = @transform_3, window_bounds = array<i64: 128, 64>}, {pipeline_mode = #tpu.pipeline_mode<synchronous>, transform_indices = @transform_4, window_bounds = array<i64: 1, 64>}, {pipeline_mode = #tpu.pipeline_mode<synchronous>, transform_indices = @transform_5, window_bounds = array<i64: 1, 64>}, {pipeline_mode = #tpu.pipeline_mode<synchronous>, transform_indices = @transform_6, window_bounds = array<i64: 1, 1>}, {transform_indices = @transform_7, window_bounds = array<i64: 1, 128>}]} {
    %c0 = arith.constant 0 : index
    %c0_0 = arith.constant 0 : index
    %0 = vector.load %arg1[%c0, %c0_0] : memref<128x32xf32, #tpu.memory_space<vmem>>, vector<128x32xf32>
    %c0_1 = arith.constant 0 : index
    %c0_2 = arith.constant 0 : index
    %1 = vector.load %arg2[%c0_1, %c0_2] : memref<32x128xf32, #tpu.memory_space<vmem>>, vector<32x128xf32>
    %cst = arith.constant dense<0.000000e+00> : vector<128x128xf32>
    %2 = tpu.matmul %0, %1, %cst {dimension_numbers = #tpu.dot_dimension_numbers<[1], [0], [0], [1], [0, 0, 1, 1], [], []>} : vector<128x32xf32>, vector<32x128xf32>, vector<128x128xf32> -> vector<128x128xf32>
    %c0_3 = arith.constant 0 : index
    %c0_4 = arith.constant 0 : index
    %3 = vector.load %arg3[%c0_3, %c0_4] : memref<1x128xf32, #tpu.memory_space<vmem>>, vector<1x128xf32>
    %4 = vector.broadcast %3 : vector<1x128xf32> to vector<128x128xf32>
    %5 = arith.addf %2, %4 : vector<128x128xf32>
    %cst_5 = arith.constant 0.000000e+00 : f32
    %6 = vector.broadcast %cst_5 : f32 to vector<128x128xf32>
    %7 = arith.maximumf %5, %6 : vector<128x128xf32>
    %c0_6 = arith.constant 0 : index
    %c0_7 = arith.constant 0 : index
    %8 = vector.load %arg4[%c0_6, %c0_7] : memref<128x64xf32, #tpu.memory_space<vmem>>, vector<128x64xf32>
    %cst_8 = arith.constant dense<0.000000e+00> : vector<128x64xf32>
    %9 = tpu.matmul %7, %8, %cst_8 {dimension_numbers = #tpu.dot_dimension_numbers<[1], [0], [0], [1], [0, 0, 1, 1], [], []>} : vector<128x128xf32>, vector<128x64xf32>, vector<128x64xf32> -> vector<128x64xf32>
    %c0_9 = arith.constant 0 : index
    %c0_10 = arith.constant 0 : index
    %10 = vector.load %arg5[%c0_9, %c0_10] : memref<1x64xf32, #tpu.memory_space<vmem>>, vector<1x64xf32>
    %11 = vector.broadcast %10 : vector<1x64xf32> to vector<128x64xf32>
    %12 = arith.addf %9, %11 : vector<128x64xf32>
    %cst_11 = arith.constant 0.000000e+00 : f32
    %13 = vector.broadcast %cst_11 : f32 to vector<128x64xf32>
    %14 = arith.maximumf %12, %13 : vector<128x64xf32>
    %c0_12 = arith.constant 0 : index
    %c0_13 = arith.constant 0 : index
    %15 = vector.load %arg6[%c0_12, %c0_13] : memref<1x64xf32, #tpu.memory_space<vmem>>, vector<1x64xf32>
    "tpu.trace_start"() <{level = 10 : i32, message = "ok,bk->ob"}> : () -> ()
    %cst_14 = arith.constant dense<0.000000e+00> : vector<1x128xf32>
    %16 = tpu.matmul %15, %14, %cst_14 {dimension_numbers = #tpu.dot_dimension_numbers<[1], [1], [0], [0], [0, 0, 1, 0], [], []>} : vector<1x64xf32>, vector<128x64xf32>, vector<1x128xf32> -> vector<1x128xf32>
    "tpu.trace_stop"() : () -> ()
    %c0_15 = arith.constant 0 : index
    %c0_16 = arith.constant 0 : index
    %17 = vector.load %arg7[%c0_15, %c0_16] : memref<1x1xf32, #tpu.memory_space<vmem>>, vector<1x1xf32>
    %18 = vector.broadcast %17 : vector<1x1xf32> to vector<1x128xf32>
    %19 = arith.addf %16, %18 : vector<1x128xf32>
    %20 = math.absf %19 : vector<1x128xf32>
    %cst_17 = arith.constant 0.000000e+00 : f32
    %21 = vector.broadcast %cst_17 : f32 to vector<1x128xf32>
    %22 = arith.subf %21, %20 : vector<1x128xf32>
    %23 = math.exp %22 : vector<1x128xf32>
    %cst_18 = arith.constant 0.000000e+00 : f32
    %24 = vector.broadcast %cst_18 : f32 to vector<1x128xf32>
    %25 = arith.cmpf oge, %19, %24 : vector<1x128xf32>
    %cst_19 = arith.constant 1.000000e+00 : f32
    %26 = vector.broadcast %cst_19 : f32 to vector<1x128xf32>
    %27 = arith.select %25, %26, %23 : vector<1x128xi1>, vector<1x128xf32>
    %cst_20 = arith.constant 1.000000e+00 : f32
    %28 = vector.broadcast %cst_20 : f32 to vector<1x128xf32>
    %29 = arith.addf %28, %23 : vector<1x128xf32>
    %30 = tpu.reciprocal %29 : vector<1x128xf32> -> vector<1x128xf32>
    %31 = arith.mulf %27, %30 : vector<1x128xf32>
    %c0_21 = arith.constant 0 : index
    %c0_22 = arith.constant 0 : index
    %32 = vector.load %arg8[%c0_21, %c0_22] : memref<1x128xf32, #tpu.memory_space<vmem>>, vector<1x128xf32>
    tpu.vector_store %arg8[%c0_21, %c0_22], %31 {strides = array<i32>} : memref<1x128xf32, #tpu.memory_space<vmem>>, vector<1x128xf32>,
    return
  }
  func.func @transform_0(%arg0: i32) -> (i32, i32) {
    %c0_i32 = arith.constant 0 : i32
    %c0_i32_0 = arith.constant 0 : i32
    return %arg0, %c0_i32 : i32, i32
  }
  func.func @transform_1(%arg0: i32) -> (i32, i32) {
    %c0_i32 = arith.constant 0 : i32
    %c0_i32_0 = arith.constant 0 : i32
    %c0_i32_1 = arith.constant 0 : i32
    return %c0_i32, %c0_i32_0 : i32, i32
  }
  func.func @transform_2(%arg0: i32) -> (i32, i32) {
    %c0_i32 = arith.constant 0 : i32
    %c0_i32_0 = arith.constant 0 : i32
    %c0_i32_1 = arith.constant 0 : i32
    return %c0_i32, %c0_i32_0 : i32, i32
  }
  func.func @transform_3(%arg0: i32) -> (i32, i32) {
    %c0_i32 = arith.constant 0 : i32
    %c0_i32_0 = arith.constant 0 : i32
    %c0_i32_1 = arith.constant 0 : i32
    return %c0_i32, %c0_i32_0 : i32, i32
  }
  func.func @transform_4(%arg0: i32) -> (i32, i32) {
    %c0_i32 = arith.constant 0 : i32
    %c0_i32_0 = arith.constant 0 : i32
    %c0_i32_1 = arith.constant 0 : i32
    return %c0_i32, %c0_i32_0 : i32, i32
  }
  func.func @transform_5(%arg0: i32) -> (i32, i32) {
    %c0_i32 = arith.constant 0 : i32
    %c0_i32_0 = arith.constant 0 : i32
    %c0_i32_1 = arith.constant 0 : i32
    return %c0_i32, %c0_i32_0 : i32, i32
  }
  func.func @transform_6(%arg0: i32) -> (i32, i32) {
    %c0_i32 = arith.constant 0 : i32
    %c0_i32_0 = arith.constant 0 : i32
    %c0_i32_1 = arith.constant 0 : i32
    return %c0_i32, %c0_i32_0 : i32, i32
  }
  func.func @transform_7(%arg0: i32) -> (i32, i32) {
    %c0_i32 = arith.constant 0 : i32
    %c0_i32_0 = arith.constant 0 : i32
    return %arg0, %c0_i32 : i32, i32
  }
}

</mosaic_0001>

<bundles_post_ra>
// kernel: tpu_custom_call.1
= control target key start
LH: loop header
LB: loop body
LE: loop exit
PB: predicated region body
PF: predicated region fallthrough
CT: control target
= control target key end

     0   :  { %s1091_s0 = inlined_call_operand.vmem [shape: f32[128,32], index: 0, kind: input, shape index: {}]   ;;  %s1092_s1 = inlined_call_operand.vmem [shape: f32[32,128], index: 1, kind: input, shape index: {}]   ;;  %s1093_s2 = inlined_call_operand.vmem [shape: f32[1,128], index: 2, kind: input, shape index: {}]   ;;  %s1094_s3 = inlined_call_operand.vmem [shape: f32[128,64], index: 3, kind: input, shape index: {}]   ;;  %s1095_s4 = inlined_call_operand.vmem [shape: f32[1,64], index: 4, kind: input, shape index: {}]   ;;  %s1096_s5 = inlined_call_operand.vmem [shape: f32[1,64], index: 5, kind: input, shape index: {}]   ;;  %s1097_s6 = inlined_call_operand.<no memory space> [shape: f32[1,1], index: 6, kind: input, shape index: {}]   ;;  %s1098_s7 = inlined_call_operand.hbm [shape: f32[1,128], index: 7, kind: output, shape index: {}]  }
   0x1   :  { %v12_v0 = vstv %s1097_s6 }
   0x2   :  { %13 = vst [vmem:[#allocation2] sm:$0x1] %v12_v0 }
   0x3   :  { %v48_v1 = vld [vmem:[%s1092_s1 + $0x18] sm:$0xff]  ;;  %v47_v2 = vld [vmem:[%s1092_s1 + $0x10] sm:$0xff]  ;;  %vm56_vm0 = vcmask 261120   ;;  %v29_v3 = vld [vmem:[%s1091_s0] sm:$0xff] }
   0x4   :  { %711 = vmatprep.subr.mxu1 %v48_v1  ;;  %v46_v4 = vld [vmem:[%s1092_s1 + $0x8] sm:$0xff]  ;;  %719 = vmatprep.mubr.msk.f32.mxu1 %vm56_vm0, %v29_v3  ;;  %v45_v5 = vld [vmem:[%s1092_s1] sm:$0xff]  ;;  %v281_v7 = vld [vmem:[%s1094_s3 + $0x78] sm:$0xff] }
   0x5   :  { %712 = vmatpush3.msra.mxu1 %v48_v1  ;;  %v30_v6 = vld [vmem:[%s1091_s0 + $0x8] sm:$0xff]  ;;  %v31_v8 = vld [vmem:[%s1091_s0 + $0x10] sm:$0xff]  ;;  %v32_v10 = vld [vmem:[%s1091_s0 + $0x18] sm:$0xff] }
   0x6   :  { %713 = vmatprep.subr.mxu1 %v47_v2  ;;  %v280_v9 = vld [vmem:[%s1094_s3 + $0x70] sm:$0xff]  ;;  %v279_v11 = vld [vmem:[%s1094_s3 + $0x68] sm:$0xff]  ;;  %v33_v12 = vld [vmem:[%s1091_s0 + $0x20] sm:$0xff] }
   0x7   :  { %714 = vmatpush3.msra.mxu1 %v47_v2 }
   0x8   :  { %715 = vmatprep.subr.mxu1 %v46_v4 }
   0x9   :  { %716 = vmatpush3.msra.mxu1 %v46_v4 }
   0xa   :  { %717 = vmatprep.subr.mxu1 %v45_v5 }
   0xb   :  { %718 = vmatpush3.msra.mxu1 %v45_v5 }
   0xc   :  { %720 = vmatmul.mubr.msk.f32.vlgmr.msra.gmra.mxu1 %vm56_vm0, %v30_v6  ;;  %743 = vmatprep.subr.mxu1 %v281_v7 }
   0xd   :  { %722 = vmatprep.mubr.msk.f32.mxu1 %vm56_vm0, %v31_v8  ;;  %744 = vmatpush3.msra.mxu1 %v281_v7 }
   0xe   :  { %745 = vmatprep.subr.mxu1 %v280_v9 }
   0xf   :  { %14 = vsyncpa [#allocation4], 0  ;;  %746 = vmatpush3.msra.mxu1 %v280_v9  ;;  %v278_v13 = vld [vmem:[%s1094_s3 + $0x60] sm:$0xff]  ;;  %v34_v14 = vld [vmem:[%s1091_s0 + $0x28] sm:$0xff]  ;;  %vm866_vm1 = vmmov 0   ;;  %vm461_vm2 = vcmask 523264  }
  0x10   :  { %723 = vmatmul.mubr.msk.f32.gmra.mxu1 %vm56_vm0, %v32_v10  ;;  %747 = vmatprep.subr.mxu1 %v279_v11  ;;  %v277_v15 = vld [vmem:[%s1094_s3 + $0x58] sm:$0xff]  ;;  %v35_v16 = vld [vmem:[%s1091_s0 + $0x30] sm:$0xff]  ;;  %v275_v19 = vld [vmem:[%s1094_s3 + $0x48] sm:$0xff]  ;;  %s868_s25 = smov [#allocation3]  }
  0x11   :  { %725 = vmatprep.mubr.msk.f32.mxu1 %vm56_vm0, %v33_v12  ;;  %748 = vmatpush3.msra.mxu1 %v279_v11  ;;  %v276_v17 = vld [vmem:[%s1094_s3 + $0x50] sm:$0xff]  ;;  %v36_v18 = vld [vmem:[%s1091_s0 + $0x38] sm:$0xff]  ;;  %v37_v20 = vld [vmem:[%s1091_s0 + $0x40] sm:$0xff]  ;;  %s599_s26 = sshll.u32 %s868_s25, 4  ;;  %s600_s26 = int_to_ptr.vmem [resolvable:$true] %s599_s26 }
  0x12   :  { %749 = vmatprep.subr.mxu1 %v278_v13  ;;  %v274_v21 = vld [vmem:[%s1094_s3 + $0x40] sm:$0xff]  ;;  %v38_v22 = vld [vmem:[%s1091_s0 + $0x48] sm:$0xff]  ;;  %v273_v23 = vld [vmem:[%s1094_s3 + $0x38] sm:$0xff]  ;;  %s847_s27 = scalar_lea.vmem %s600_s26, 32  ;;  %p848_p1 = scmp.lt.s32.totalorder %s600_s26, %s600_s26 }
  0x13   :  { %750 = vmatpush3.msra.mxu1 %v278_v13  ;;  %v39_v24 = vld [vmem:[%s1091_s0 + $0x50] sm:$0xff]  ;;  %v40_v26 = vld [vmem:[%s1091_s0 + $0x58] sm:$0xff]  ;;  %v271_v27 = vld [vmem:[%s1094_s3 + $0x28] sm:$0xff] }
  0x14   :  { %726 = vmatmul.mubr.msk.f32.gmra.mxu1 %vm56_vm0, %v34_v14  ;;  %751 = vmatprep.subr.mxu1 %v277_v15  ;;  %v272_v25 = vld [vmem:[%s1094_s3 + $0x30] sm:$0xff]  ;;  %v41_v28 = vld [vmem:[%s1091_s0 + $0x60] sm:$0xff]  ;;  %v42_v30 = vld [vmem:[%s1091_s0 + $0x68] sm:$0xff] }
  0x15   :  { %728 = vmatprep.mubr.msk.f32.mxu1 %vm56_vm0, %v35_v16  ;;  %752 = vmatpush3.msra.mxu1 %v277_v15  ;;  %v270_v29 = vld [vmem:[%s1094_s3 + $0x20] sm:$0xff]  ;;  %v269_v31 = vld [vmem:[%s1094_s3 + $0x18] sm:$0xff]  ;;  %v43_v32 = vld [vmem:[%s1091_s0 + $0x70] sm:$0xff] }
  0x16   :  { %753 = vmatprep.subr.mxu1 %v276_v17  ;;  %v44_v33 = vld [vmem:[%s1091_s0 + $0x78] sm:$0xff]  ;;  %v268_v34 = vld [vmem:[%s1094_s3 + $0x10] sm:$0xff]  ;;  %v267_v35 = vld [vmem:[%s1094_s3 + $0x8] sm:$0xff] }
  0x17   :  { %754 = vmatpush3.msra.mxu1 %v276_v17  ;;  %v266_v36 = vld [vmem:[%s1094_s3] sm:$0xff] }
  0x18   :  { %729 = vmatmul.mubr.msk.f32.gmra.mxu1 %vm56_vm0, %v36_v18  ;;  %755 = vmatprep.subr.mxu1 %v275_v19  ;;  %v607_v37 = vld [vmem:[%s1093_s2] ss:$0 sm:$0xff] }
  0x19   :  { %731 = vmatprep.mubr.msk.f32.mxu1 %vm56_vm0, %v37_v20  ;;  %756 = vmatpush3.msra.mxu1 %v275_v19 }
  0x1a   :  { %757 = vmatprep.subr.mxu1 %v274_v21 }
  0x1b   :  { %758 = vmatpush3.msra.mxu1 %v274_v21 }
  0x1c   :  { %732 = vmatmul.mubr.msk.f32.gmra.mxu1 %vm56_vm0, %v38_v22  ;;  %759 = vmatprep.subr.mxu1 %v273_v23  ;;  %v865_v22 = vmov 0.0  }
  0x1d   :  { %734 = vmatprep.mubr.msk.f32.mxu1 %vm56_vm0, %v39_v24  ;;  %760 = vmatpush3.msra.mxu1 %v273_v23  ;;  %v451_v23 = vld [vmem:[#allocation2] sm:$0x1]  ;;  %v867_v24 = vmov 0  }
  0x1e   :  { %761 = vmatprep.subr.mxu1 %v272_v25  ;;  %799 = vmatprep.subr.mxu0 %v865_v22 }
  0x1f   :  { %762 = vmatpush3.msra.mxu1 %v272_v25  ;;  %831 = vmatprep.mubr.msk.f32.mxu0 %vm866_vm1, %v865_v22 }
  0x20   :  { %735 = vmatmul.mubr.msk.f32.gmra.mxu1 %vm56_vm0, %v40_v26  ;;  %763 = vmatprep.subr.mxu1 %v271_v27 }
  0x21   :  { %737 = vmatprep.mubr.msk.f32.mxu1 %vm56_vm0, %v41_v28  ;;  %764 = vmatpush3.msra.mxu1 %v271_v27 }
  0x22   :  { %765 = vmatprep.subr.mxu1 %v270_v29  ;;  %838 = vset.pattern.permute.xlu0 %v867_v24 }
  0x23   :  { %766 = vmatpush3.msra.mxu1 %v270_v29  ;;  %454 = vperm.xlu0 %838, %v451_v23  }
  0x24   :  { %738 = vmatmul.mubr.msk.f32.gmra.mxu1 %vm56_vm0, %v42_v30  ;;  %767 = vmatprep.subr.mxu1 %v269_v31 }
  0x25   :  { %740 = vmatprep.mubr.msk.f32.mxu1 %vm56_vm0, %v43_v32  ;;  %768 = vmatpush3.msra.mxu1 %v269_v31 }
  0x26   :  { %769 = vmatprep.subr.mxu1 %v268_v34 }
  0x27   :  { %770 = vmatpush3.msra.mxu1 %v268_v34 }
  0x28   :  { %741 = vmatmul.mubr.msk.f32.gmra.mxu1 %vm56_vm0, %v44_v33  ;;  %771 = vmatprep.subr.mxu1 %v267_v35 }
  0x29   :  { %772 = vmatpush3.msra.mxu1 %v267_v35 }
  0x2a   :  { %773 = vmatprep.subr.mxu1 %v266_v36 }
  0x2b   :  { %774 = vmatpush3.msra.mxu1 %v266_v36 }
  0xcc   :  { %v721_v38 = vpop.f32.mrf.mxu1 }
  0xcd   :  { %v177_v39 = vadd.f32 %v721_v38, %v607_v37 }
  0xce   :  { %v171_v40 = vpop.f32.mrf.mxu1 }
  0xcf   :  { %v172_v41 = vadd.f32 %v607_v37, %v171_v40  ;;  %v251_v44 = vmax.f32 %v177_v39, 0.0  ;;  %v624_v39 = vld [vmem:[%s1095_s4] ss:$0 sm:$0xff] }
  0xd0   :  { %v724_v42 = vpop.f32.mrf.mxu1 }
  0xd1   :  { %v250_v43 = vmax.f32 %v172_v41, 0.0  ;;  %v187_v45 = vadd.f32 %v724_v42, %v607_v37 }
  0xd2   :  { %v181_v46 = vpop.f32.mrf.mxu1 }
  0xd3   :  { %v182_v47 = vadd.f32 %v607_v37, %v181_v46  ;;  %775 = vmatprep.mubr.f32.mxu1 %v250_v43  ;;  %v253_v50 = vmax.f32 %v187_v45, 0.0 }
  0xd4   :  { %v727_v48 = vpop.f32.mrf.mxu1  ;;  %776 = vmatmul.mubr.f32.vlgmr.msra.gmra.mxu1 %v251_v44 }
  0xd5   :  { %v252_v49 = vmax.f32 %v182_v47, 0.0  ;;  %v197_v51 = vadd.f32 %v727_v48, %v607_v37 }
  0xd6   :  { %v191_v52 = vpop.f32.mrf.mxu1 }
  0xd7   :  { %v192_v53 = vadd.f32 %v607_v37, %v191_v52  ;;  %778 = vmatprep.mubr.f32.mxu1 %v252_v49  ;;  %v255_v56 = vmax.f32 %v197_v51, 0.0 }
  0xd8   :  { %v730_v54 = vpop.f32.mrf.mxu1  ;;  %779 = vmatmul.mubr.f32.gmra.mxu1 %v253_v50 }
  0xd9   :  { %v254_v55 = vmax.f32 %v192_v53, 0.0  ;;  %v207_v57 = vadd.f32 %v730_v54, %v607_v37 }
  0xda   :  { %v201_v58 = vpop.f32.mrf.mxu1 }
  0xdb   :  { %v202_v59 = vadd.f32 %v607_v37, %v201_v58  ;;  %781 = vmatprep.mubr.f32.mxu1 %v254_v55  ;;  %v257_v62 = vmax.f32 %v207_v57, 0.0 }
  0xdc   :  { %v733_v60 = vpop.f32.mrf.mxu1  ;;  %782 = vmatmul.mubr.f32.gmra.mxu1 %v255_v56 }
  0xdd   :  { %v256_v61 = vmax.f32 %v202_v59, 0.0  ;;  %v217_v63 = vadd.f32 %v733_v60, %v607_v37 }
  0xde   :  { %v211_v0 = vpop.f32.mrf.mxu1 }
  0xdf   :  { %v212_v1 = vadd.f32 %v607_v37, %v211_v0  ;;  %784 = vmatprep.mubr.f32.mxu1 %v256_v61  ;;  %v259_v4 = vmax.f32 %v217_v63, 0.0 }
  0xe0   :  { %v736_v2 = vpop.f32.mrf.mxu1  ;;  %785 = vmatmul.mubr.f32.gmra.mxu1 %v257_v62 }
  0xe1   :  { %v258_v3 = vmax.f32 %v212_v1, 0.0  ;;  %v227_v5 = vadd.f32 %v736_v2, %v607_v37 }
  0xe2   :  { %v221_v6 = vpop.f32.mrf.mxu1 }
  0xe3   :  { %v222_v7 = vadd.f32 %v607_v37, %v221_v6  ;;  %787 = vmatprep.mubr.f32.mxu1 %v258_v3  ;;  %v261_v10 = vmax.f32 %v227_v5, 0.0 }
  0xe4   :  { %v739_v8 = vpop.f32.mrf.mxu1  ;;  %788 = vmatmul.mubr.f32.gmra.mxu1 %v259_v4 }
  0xe5   :  { %v260_v9 = vmax.f32 %v222_v7, 0.0  ;;  %v237_v11 = vadd.f32 %v739_v8, %v607_v37 }
  0xe6   :  { %v231_v12 = vpop.f32.mrf.mxu1 }
  0xe7   :  { %v232_v13 = vadd.f32 %v607_v37, %v231_v12  ;;  %790 = vmatprep.mubr.f32.mxu1 %v260_v9  ;;  %v263_v16 = vmax.f32 %v237_v11, 0.0  ;;  %v457_v11 = vlaneseq }
  0xe8   :  { %v742_v14 = vpop.f32.mrf.mxu1  ;;  %791 = vmatmul.mubr.f32.gmra.mxu1 %v261_v10  ;;  %v450_v10 = vld [vmem:[%s1096_s5] sm:$0x1]  ;;  %s843_s5 = scalar_lea.vmem %s600_s26, 16 }
  0xe9   :  { %v262_v15 = vmax.f32 %v232_v13, 0.0  ;;  %v247_v17 = vadd.f32 %v742_v14, %v607_v37  ;;  %v458_v12 = vshrl.u32 %v457_v11, 7  ;;  %v455_v14 = vpop.permute.xlu0 %454  ;;  %p844_p0 = scmp.ne.s32.totalorder %s600_s26, %s843_s5  ;;  %p849_p2 = scmp.lt.s32.totalorder %s847_s27, %s843_s5 }
  0xea   :  { %v241_v18 = vpop.f32.mrf.mxu1 }
  0xeb   :  { %v242_v19 = vadd.f32 %v607_v37, %v241_v18  ;;  %793 = vmatprep.mubr.f32.mxu1 %v262_v15  ;;  %v265_v21 = vmax.f32 %v247_v17, 0.0  ;;  %v459_v13 = vsub.s32 0, %v458_v12  ;;  %p850_p3 = por %p849_p2, %p848_p1 }
  0xec   :  { %794 = vmatmul.mubr.f32.gmra.mxu1 %v263_v16 }
  0xed   :  { %v264_v20 = vmax.f32 %v242_v19, 0.0  ;;  %v460_v15 = vrot.slane %v455_v14, %v459_v13  ;;  %p851_p4 = pnand %p850_p3, %p844_p0 }
  0xef   :  { %796 = vmatprep.mubr.f32.mxu1 %v264_v20 }
  0xf0   :  { %797 = vmatmul.mubr.f32.gmra.mxu1 %v265_v21 }
 0x194   :  { %v1041_v25 = vpop.f32.mrf.mxu1 }
 0x195   :  { %v361_v5 = vadd.f32 %v1041_v25, %v624_v39 }
 0x196   :  { %v1043_v26 = vpop.f32.mrf.mxu1 }
 0x197   :  { %v435_v7 = vmax.f32 %v361_v5, 0.0  ;;  %v356_v8 = vadd.f32 %v624_v39, %v1043_v26 }
 0x198   :  { %v780_v27 = vpop.f32.mrf.mxu1 }
 0x199   :  { %v371_v1 = vadd.f32 %v780_v27, %v624_v39  ;;  %v434_v9 = vmax.f32 %v356_v8, 0.0 }
 0x19a   :  { %v1045_v28 = vpop.f32.mrf.mxu1 }
 0x19b   :  { %v437_v3 = vmax.f32 %v371_v1, 0.0  ;;  %v366_v4 = vadd.f32 %v624_v39, %v1045_v28 }
 0x19c   :  { %v783_v29 = vpop.f32.mrf.mxu1 }
 0x19d   :  { %v381_v61 = vadd.f32 %v783_v29, %v624_v39  ;;  %v436_v6 = vmax.f32 %v366_v4, 0.0 }
 0x19e   :  { %v375_v30 = vpop.f32.mrf.mxu1 }
 0x19f   :  { %v439_v63 = vmax.f32 %v381_v61, 0.0  ;;  %v376_v0 = vadd.f32 %v624_v39, %v375_v30 }
 0x1a0   :  { %v786_v31 = vpop.f32.mrf.mxu1 }
 0x1a1   :  { %v391_v57 = vadd.f32 %v786_v31, %v624_v39  ;;  %v438_v2 = vmax.f32 %v376_v0, 0.0 }
 0x1a2   :  { %v385_v32 = vpop.f32.mrf.mxu1 }
 0x1a3   :  { %v441_v59 = vmax.f32 %v391_v57, 0.0  ;;  %v386_v60 = vadd.f32 %v624_v39, %v385_v32 }
 0x1a4   :  { %v789_v33 = vpop.f32.mrf.mxu1 }
 0x1a5   :  { %v401_v53 = vadd.f32 %v789_v33, %v624_v39  ;;  %v440_v62 = vmax.f32 %v386_v60, 0.0 }
 0x1a6   :  { %v395_v34 = vpop.f32.mrf.mxu1 }
 0x1a7   :  { %v443_v55 = vmax.f32 %v401_v53, 0.0  ;;  %v396_v56 = vadd.f32 %v624_v39, %v395_v34 }
 0x1a8   :  { %v792_v35 = vpop.f32.mrf.mxu1 }
 0x1a9   :  { %v411_v49 = vadd.f32 %v792_v35, %v624_v39  ;;  %v442_v58 = vmax.f32 %v396_v56, 0.0 }
 0x1aa   :  { %v405_v36 = vpop.f32.mrf.mxu1 }
 0x1ab   :  { %v445_v51 = vmax.f32 %v411_v49, 0.0  ;;  %v406_v52 = vadd.f32 %v624_v39, %v405_v36 }
 0x1ac   :  { %v795_v37 = vpop.f32.mrf.mxu1 }
 0x1ad   :  { %v421_v45 = vadd.f32 %v795_v37, %v624_v39  ;;  %v444_v54 = vmax.f32 %v406_v52, 0.0 }
 0x1ae   :  { %v415_v38 = vpop.f32.mrf.mxu1 }
 0x1af   :  { %v447_v47 = vmax.f32 %v421_v45, 0.0  ;;  %v416_v48 = vadd.f32 %v624_v39, %v415_v38 }
 0x1b0   :  { %v798_v40 = vpop.f32.mrf.mxu1 }
 0x1b1   :  { %v431_v41 = vadd.f32 %v798_v40, %v624_v39  ;;  %v446_v50 = vmax.f32 %v416_v48, 0.0 }
 0x1b2   :  { %v425_v42 = vpop.f32.mrf.mxu1 }
 0x1b3   :  { %v449_v43 = vmax.f32 %v431_v41, 0.0  ;;  %v426_v44 = vadd.f32 %v624_v39, %v425_v42 }
 0x1b5   :  { %800 = vmatpush3.xpose.msk.msra.mxu0 %vm461_vm2, %v449_v43  ;;  %v448_v46 = vmax.f32 %v426_v44, 0.0 }
 0x1b6   :  { %801 = vmatprep.subr.mxu0 %v865_v22 }
 0x1b9   :  { %802 = vmatpush3.xpose.msk.msra.mxu0 %vm461_vm2, %v448_v46 }
 0x1ba   :  { %803 = vmatprep.subr.mxu0 %v865_v22 }
 0x1bd   :  { %804 = vmatpush3.xpose.msk.msra.mxu0 %vm461_vm2, %v447_v47 }
 0x1be   :  { %805 = vmatprep.subr.mxu0 %v865_v22 }
 0x1c1   :  { %806 = vmatpush3.xpose.msk.msra.mxu0 %vm461_vm2, %v446_v50 }
 0x1c2   :  { %807 = vmatprep.subr.mxu0 %v865_v22 }
 0x1c5   :  { %808 = vmatpush3.xpose.msk.msra.mxu0 %vm461_vm2, %v445_v51 }
 0x1c6   :  { %809 = vmatprep.subr.mxu0 %v865_v22 }
 0x1c9   :  { %810 = vmatpush3.xpose.msk.msra.mxu0 %vm461_vm2, %v444_v54 }
 0x1ca   :  { %811 = vmatprep.subr.mxu0 %v865_v22 }
 0x1cd   :  { %812 = vmatpush3.xpose.msk.msra.mxu0 %vm461_vm2, %v443_v55 }
 0x1ce   :  { %813 = vmatprep.subr.mxu0 %v865_v22 }
 0x1d1   :  { %814 = vmatpush3.xpose.msk.msra.mxu0 %vm461_vm2, %v442_v58 }
 0x1d2   :  { %815 = vmatprep.subr.mxu0 %v865_v22 }
 0x1d5   :  { %816 = vmatpush3.xpose.msk.msra.mxu0 %vm461_vm2, %v441_v59 }
 0x1d6   :  { %817 = vmatprep.subr.mxu0 %v865_v22 }
 0x1d9   :  { %818 = vmatpush3.xpose.msk.msra.mxu0 %vm461_vm2, %v440_v62 }
 0x1da   :  { %819 = vmatprep.subr.mxu0 %v865_v22 }
 0x1dd   :  { %820 = vmatpush3.xpose.msk.msra.mxu0 %vm461_vm2, %v439_v63 }
 0x1de   :  { %821 = vmatprep.subr.mxu0 %v865_v22 }
 0x1e1   :  { %822 = vmatpush3.xpose.msk.msra.mxu0 %vm461_vm2, %v438_v2 }
 0x1e2   :  { %823 = vmatprep.subr.mxu0 %v865_v22 }
 0x1e5   :  { %824 = vmatpush3.xpose.msk.msra.mxu0 %vm461_vm2, %v437_v3 }
 0x1e6   :  { %825 = vmatprep.subr.mxu0 %v865_v22 }
 0x1e9   :  { %826 = vmatpush3.xpose.msk.msra.mxu0 %vm461_vm2, %v436_v6 }
 0x1ea   :  { %827 = vmatprep.subr.mxu0 %v865_v22 }
 0x1ed   :  { %828 = vmatpush3.xpose.msk.msra.mxu0 %vm461_vm2, %v435_v7 }
 0x1ee   :  { %829 = vmatprep.subr.mxu0 %v865_v22 }
 0x1f1   :  { %830 = vmatpush3.xpose.msk.msra.mxu0 %vm461_vm2, %v434_v9 }
 0x1f4   :  { %832 = vmatmul.mubr.msk.f32.vlgmr.msra.gmra.mxu0 %vm461_vm2, %v450_v10 }
 0x2b4   :  { %v579_v16 = vpop.f32.mrf.mxu0 }
 0x2b5   :  { %v580_v17 = vadd.f32 %v579_v16, %v460_v15 }
 0x2b6   :  { %v833_v18 = vpop.f32.mrf.mxu0 }
 0x2b7   :  { %v583_v19 = vand.u32 2147483647, %v580_v17  ;;  %vm587_vm3 = vcmp.ge.f32.partialorder %v580_v17, 0.0 }
 0x2b9   :  { %v584_v20 = vsub.f32 0.0, %v583_v19 }
 0x2bb   :  { %v585_v21 = vmul.f32 1.442695, %v584_v20 }
 0x2bd   :  { %839 = vpow2.f32 %v585_v21 }
 0x2ca   :  { %v840_v22 = vpop.eup %839 }
 0x2cb   :  { %v589_v23 = vadd.f32 1.0, %v840_v22  ;;  %v588_v25 = vsel %vm587_vm3, 1.0, %v840_v22 }
 0x2cd   :  { %841 = vrcp.f32 %v589_v23 }
 0x2da   :  { %v842_v24 = vpop.eup %841 }
 0x2db   :  { %v591_v26 = vmul.f32 %v842_v24, %v588_v25 }
 0x2dd   :  { %592 = vst [vmem:[#allocation3] sm:$0x1] %v591_v26 }
 0x2de   :  { %854 = shalt.err (!%p851_p4)
}
 0x2df   :  { %602 = dma.vmem_to_hbm [thread:$0]  %s600_s26, 16, %s1098_s7, [#allocation4]  }
 0x2e0   :  { %863 = dma.done.wait [#allocation4], 16  }
 0x2e1   :  { %864 = vsyncadd [#allocation4], 4294967280 }
 0x2e2   :  { %606 = vsyncpa [#allocation4], 1 }

</bundles_post_ra>
